<compile_context>
chip_gen: v5e
topology: v5e:2x2
jax: 0.10.0
libtpu: 0.0.40
codegen_flags: <defaults>
</compile_context>

<pallas_src>
import functools

import jax
import jax.numpy as jnp
from jax.experimental import pallas as pl
from jax.experimental.pallas import tpu as pltpu

EPS = 1e-3


# ----------------------------------------------------------------------------
# Generation-aware budgets.
# ----------------------------------------------------------------------------
def _tpu_vmem_capacity_bytes():
    try:
        return int(pltpu.get_tpu_info().vmem_capacity_bytes)
    except Exception:
        return 64 * 1024 * 1024  # conservative default (v7x per-TensorCore)


def _budgets():
    cap = _tpu_vmem_capacity_bytes()
    # Leave explicit headroom for Pallas double-buffers / compiler scratch.
    vmem_limit = min(int(cap * 0.8), cap - 12 * 1024 * 1024)
    vmem_limit = max(vmem_limit, 32 * 1024 * 1024)
    # Fused single-block path keeps ~3-4x the f32 tensor live in VMEM
    # (input block, one elementwise temp, output block) -> /5 for margin.
    resident_max = vmem_limit // 5
    # 4 MiB blocks on 64 MiB parts (v7x), 8 MiB blocks on 128 MiB parts.
    max_hw_tile = 8192 if cap <= 96 * 1024 * 1024 else 16384
    return vmem_limit, resident_max, max_hw_tile


# ----------------------------------------------------------------------------
# Fused path: whole tensor resident in VMEM, one read + one write of HBM.
# ----------------------------------------------------------------------------
def bn_relu_fused_kernel(x_ref, gamma_ref, beta_ref, o_ref, *, inv_count):
    x = x_ref[...].astype(jnp.float32)                 # (N, C, HW)
    s = jnp.sum(x, axis=2, keepdims=True)              # (N, C, 1) lane reduce
    sq = jnp.sum(x * x, axis=2, keepdims=True)
    s = jnp.sum(s, axis=0, keepdims=True)              # (1, C, 1)
    sq = jnp.sum(sq, axis=0, keepdims=True)
    mean = s * inv_count
    var = sq * inv_count - mean * mean                 # biased variance
    inv_std = jax.lax.rsqrt(var + EPS)
    scale = gamma_ref[...] * inv_std                   # (1, C, 1)
    shift = beta_ref[...] - mean * scale
    o_ref[...] = jnp.maximum(x * scale + shift, 0.0).astype(o_ref.dtype)


# ----------------------------------------------------------------------------
# Streaming path, phase 1: per-(n, t) partial sums (fully parallel grid).
# ----------------------------------------------------------------------------
def bn_partial_stats_kernel(x_ref, psum_ref, psq_ref, *, hw, hw_tile,
                            need_mask):
    x = x_ref[...].astype(jnp.float32)                 # (1, C, hw_tile)
    if need_mask:
        # Ragged last tile: zero the out-of-bounds lanes before reducing.
        start = pl.program_id(1) * hw_tile
        lane = jax.lax.broadcasted_iota(jnp.int32, x.shape, 2)
        x = jnp.where(start + lane < hw, x, 0.0)
    psum_ref[...] = jnp.sum(x, axis=2, keepdims=True)  # (1, C, 1)
    psq_ref[...] = jnp.sum(x * x, axis=2, keepdims=True)


# ----------------------------------------------------------------------------
# Streaming path, phase 2: x*scale + shift (lane-broadcast FMA) + ReLU.
# ----------------------------------------------------------------------------
def bn_apply_relu_kernel(x_ref, scale_ref, shift_ref, o_ref):
    x = x_ref[...].astype(jnp.float32)                 # (1, C, hw_tile)
    y = x * scale_ref[...] + shift_ref[...]
    o_ref[...] = jnp.maximum(y, 0.0).astype(o_ref.dtype)


# ----------------------------------------------------------------------------
# Wrapper.
# ----------------------------------------------------------------------------
def batchnorm_relu(x_nchw, gamma, beta, *, max_hw_tile=None,
                   resident_bytes_max=None, vmem_limit_bytes=None):
    """x_nchw: (N, C, H, W); gamma, beta: (C,).  Returns NCHW output."""
    N, C, H, W = x_nchw.shape
    HW = H * W
    x3d = x_nchw.reshape(N, C, HW)                     # free reshape (layout)
    g = gamma.astype(jnp.float32).reshape(1, C, 1)
    b = beta.astype(jnp.float32).reshape(1, C, 1)
    inv_count = 1.0 / float(N * HW)                    # true divisor

    auto_vmem, auto_resident, auto_tile = _budgets()
    vmem_limit = auto_vmem if vmem_limit_bytes is None else vmem_limit_bytes
    resident_max = (auto_resident if resident_bytes_max is None
                    else resident_bytes_max)
    if max_hw_tile is None:
        max_hw_tile = auto_tile
    max_hw_tile = max(128, (max_hw_tile // 128) * 128)

    f32_working_bytes = N * C * HW * 4

    if f32_working_bytes <= resident_max:
        # VMEM-resident regime: single fused block, 1 HBM read + 1 write.
        out3d = pl.pallas_call(
            functools.partial(bn_relu_fused_kernel, inv_count=inv_count),
            out_shape=jax.ShapeDtypeStruct((N, C, HW), x_nchw.dtype),
            in_specs=[
                pl.BlockSpec((N, C, HW), lambda: (0, 0, 0)),
                pl.BlockSpec((1, C, 1), lambda: (0, 0, 0)),
                pl.BlockSpec((1, C, 1), lambda: (0, 0, 0)),
            ],
            out_specs=pl.BlockSpec((N, C, HW), lambda: (0, 0, 0)),
            compiler_params=pltpu.CompilerParams(
                vmem_limit_bytes=vmem_limit),
        )(x3d, g, b)
        return out3d.reshape(N, C, H, W)

    # ---- Out-of-VMEM regime: two streaming passes (2 reads + 1 write). ----
    hw_tile = min(max_hw_tile, ((HW + 127) // 128) * 128)
    grid_t = (HW + hw_tile - 1) // hw_tile
    grid = (N, grid_t)
    need_mask = (HW % hw_tile) != 0

    # Phase 1: per-tile partial sum / sumsq.  Every grid step owns its own
    # output block -> both axes "parallel" (megacore split on v7x).
    psum, psq = pl.pallas_call(
        functools.partial(bn_partial_stats_kernel, hw=HW, hw_tile=hw_tile,
                          need_mask=need_mask),
        out_shape=(jax.ShapeDtypeStruct((N * grid_t, C, 1), jnp.float32),
                   jax.ShapeDtypeStruct((N * grid_t, C, 1), jnp.float32)),
        grid_spec=pltpu.PrefetchScalarGridSpec(
            num_scalar_prefetch=0,
            grid=grid,
            in_specs=[
                pl.BlockSpec((1, C, hw_tile), lambda n, t: (n, 0, t)),
            ],
            out_specs=[
                pl.BlockSpec((1, C, 1), lambda n, t: (n * grid_t + t, 0, 0)),
                pl.BlockSpec((1, C, 1), lambda n, t: (n * grid_t + t, 0, 0)),
            ],
        ),
        compiler_params=pltpu.CompilerParams(
            dimension_semantics=("parallel", "parallel"),
            vmem_limit_bytes=vmem_limit),
    )(x3d)

    # Tiny combine + BN fold (C=128 elements) in plain JAX.
    s = jnp.sum(psum, axis=0)                          # (C, 1)
    sq = jnp.sum(psq, axis=0)
    mean = s * inv_count
    var = sq * inv_count - mean * mean
    inv_std = jax.lax.rsqrt(var + EPS)
    scale_c = gamma.astype(jnp.float32).reshape(C, 1) * inv_std
    shift_c = beta.astype(jnp.float32).reshape(C, 1) - mean * scale_c
    scale = scale_c.reshape(1, C, 1)
    shift = shift_c.reshape(1, C, 1)

    # Phase 2: stream x once, per-channel FMA + ReLU, fully parallel.
    out3d = pl.pallas_call(
        bn_apply_relu_kernel,
        out_shape=jax.ShapeDtypeStruct((N, C, HW), x_nchw.dtype),
        grid_spec=pltpu.PrefetchScalarGridSpec(
            num_scalar_prefetch=0,
            grid=grid,
            in_specs=[
                pl.BlockSpec((1, C, hw_tile), lambda n, t: (n, 0, t)),
                pl.BlockSpec((1, C, 1), lambda n, t: (0, 0, 0)),
                pl.BlockSpec((1, C, 1), lambda n, t: (0, 0, 0)),
            ],
            out_specs=pl.BlockSpec((1, C, hw_tile), lambda n, t: (n, 0, t)),
        ),
        compiler_params=pltpu.CompilerParams(
            dimension_semantics=("parallel", "parallel"),
            vmem_limit_bytes=vmem_limit),
    )(x3d, scale, shift)

    return out3d.reshape(N, C, H, W)


# ----------------------------------------------------------------------------
# Pure-JAX reference (torch BatchNorm2d training-mode batch stats + ReLU).
# ----------------------------------------------------------------------------
def reference(x_nchw, gamma, beta):
    mean = jnp.mean(x_nchw, axis=(0, 2, 3), keepdims=True)
    var = jnp.mean((x_nchw - mean) ** 2, axis=(0, 2, 3), keepdims=True)
    y = (x_nchw - mean) * jax.lax.rsqrt(var + EPS)
    y = y * gamma.reshape(1, -1, 1, 1) + beta.reshape(1, -1, 1, 1)
    return jnp.maximum(y, 0.0)


if __name__ == "__main__":
    key = jax.random.PRNGKey(0)
    kx, kg, kb, kx2, kx3 = jax.random.split(key, 5)

    gamma = 1.0 + 0.1 * jax.random.normal(kg, (128,), dtype=jnp.float32)
    beta = 0.1 * jax.random.normal(kb, (128,), dtype=jnp.float32)

    # The module's exact shape: (1, 128, 7, 7) -> fused VMEM-resident path.
    x = jax.random.normal(kx, (1, 128, 7, 7), dtype=jnp.float32)
    out = jax.block_until_ready(batchnorm_relu(x, gamma, beta))
    assert out.shape == (1, 128, 7, 7)
    assert jnp.allclose(out, reference(x, gamma, beta), atol=1e-4, rtol=1e-4)

    # Fused path with N > 1.
    x2 = jax.random.normal(kx2, (2, 128, 16, 32), dtype=jnp.float32)
    out2 = jax.block_until_ready(batchnorm_relu(x2, gamma, beta))
    assert jnp.allclose(out2, reference(x2, gamma, beta), atol=1e-4, rtol=1e-4)

    # Force the streaming two-pass path (evenly tiled HW).
    out2t = jax.block_until_ready(
        batchnorm_relu(x2, gamma, beta, resident_bytes_max=0, max_hw_tile=256))
    assert jnp.allclose(out2t, reference(x2, gamma, beta), atol=1e-4, rtol=1e-4)

    # Force the streaming path with a ragged last tile (HW=200, tile=128).
    x3 = jax.random.normal(kx3, (2, 128, 10, 20), dtype=jnp.float32)
    out3 = jax.block_until_ready(
        batchnorm_relu(x3, gamma, beta, resident_bytes_max=0, max_hw_tile=128))
    assert jnp.allclose(out3, reference(x3, gamma, beta), atol=1e-4, rtol=1e-4)

    print("KERNEL_OK")
</pallas_src>

<mosaic_0001>
module attributes {stable_mosaic.version = 11 : i64} {
  func.func @bn_relu_fused_kernel(%arg0: memref<1x128x49xf32, #tpu.memory_space<vmem>>, %arg1: memref<1x128x1xf32, #tpu.memory_space<vmem>>, %arg2: memref<1x128x1xf32, #tpu.memory_space<vmem>>, %arg3: memref<1x128x49xf32, #tpu.memory_space<vmem>>) attributes {dimension_semantics = [], scalar_prefetch = 0 : i64, scratch_operands = 0 : i64, tpu.core_type = #tpu.core_type<tc>} {
    %c0 = arith.constant 0 : index
    %c0_0 = arith.constant 0 : index
    %c0_1 = arith.constant 0 : index
    %0 = vector.load %arg0[%c0, %c0_0, %c0_1] : memref<1x128x49xf32, #tpu.memory_space<vmem>>, vector<1x128x49xf32>
    %cst = arith.constant dense<0.000000e+00> : vector<1x128xf32>
    %1 = vector.multi_reduction <add>, %0, %cst [2] : vector<1x128x49xf32> to vector<1x128xf32>
    %2 = vector.shape_cast %1 : vector<1x128xf32> to vector<1x128x1xf32>
    %3 = arith.mulf %0, %0 : vector<1x128x49xf32>
    %cst_2 = arith.constant dense<0.000000e+00> : vector<1x128xf32>
    %4 = vector.multi_reduction <add>, %3, %cst_2 [2] : vector<1x128x49xf32> to vector<1x128xf32>
    %5 = vector.shape_cast %4 : vector<1x128xf32> to vector<1x128x1xf32>
    %cst_3 = arith.constant dense<0.000000e+00> : vector<128x1xf32>
    %6 = vector.multi_reduction <add>, %2, %cst_3 [0] : vector<1x128x1xf32> to vector<128x1xf32>
    %7 = vector.shape_cast %6 : vector<128x1xf32> to vector<1x128x1xf32>
    %cst_4 = arith.constant dense<0.000000e+00> : vector<128x1xf32>
    %8 = vector.multi_reduction <add>, %5, %cst_4 [0] : vector<1x128x1xf32> to vector<128x1xf32>
    %9 = vector.shape_cast %8 : vector<128x1xf32> to vector<1x128x1xf32>
    %cst_5 = arith.constant 0.0204081628 : f32
    %10 = vector.broadcast %cst_5 : f32 to vector<1x128x1xf32>
    %11 = arith.mulf %7, %10 : vector<1x128x1xf32>
    %cst_6 = arith.constant 0.0204081628 : f32
    %12 = vector.broadcast %cst_6 : f32 to vector<1x128x1xf32>
    %13 = arith.mulf %9, %12 : vector<1x128x1xf32>
    %14 = arith.mulf %11, %11 : vector<1x128x1xf32>
    %15 = arith.subf %13, %14 : vector<1x128x1xf32>
    %cst_7 = arith.constant 1.000000e-03 : f32
    %16 = vector.broadcast %cst_7 : f32 to vector<1x128x1xf32>
    %17 = arith.addf %15, %16 : vector<1x128x1xf32>
    %18 = math.rsqrt %17 : vector<1x128x1xf32>
    %c0_8 = arith.constant 0 : index
    %c0_9 = arith.constant 0 : index
    %c0_10 = arith.constant 0 : index
    %19 = vector.load %arg1[%c0_8, %c0_9, %c0_10] : memref<1x128x1xf32, #tpu.memory_space<vmem>>, vector<1x128x1xf32>
    %20 = arith.mulf %19, %18 : vector<1x128x1xf32>
    %c0_11 = arith.constant 0 : index
    %c0_12 = arith.constant 0 : index
    %c0_13 = arith.constant 0 : index
    %21 = vector.load %arg2[%c0_11, %c0_12, %c0_13] : memref<1x128x1xf32, #tpu.memory_space<vmem>>, vector<1x128x1xf32>
    %22 = arith.mulf %11, %20 : vector<1x128x1xf32>
    %23 = arith.subf %21, %22 : vector<1x128x1xf32>
    %24 = vector.broadcast %20 : vector<1x128x1xf32> to vector<1x128x49xf32>
    %25 = arith.mulf %0, %24 : vector<1x128x49xf32>
    %26 = vector.broadcast %23 : vector<1x128x1xf32> to vector<1x128x49xf32>
    %27 = arith.addf %25, %26 : vector<1x128x49xf32>
    %cst_14 = arith.constant 0.000000e+00 : f32
    %28 = vector.broadcast %cst_14 : f32 to vector<1x128x49xf32>
    %29 = arith.maximumf %27, %28 : vector<1x128x49xf32>
    %c0_15 = arith.constant 0 : index
    %c0_16 = arith.constant 0 : index
    %c0_17 = arith.constant 0 : index
    %30 = vector.load %arg3[%c0_15, %c0_16, %c0_17] : memref<1x128x49xf32, #tpu.memory_space<vmem>>, vector<1x128x49xf32>
    tpu.vector_store %arg3[%c0_15, %c0_16, %c0_17], %29 {strides = array<i32>} : memref<1x128x49xf32, #tpu.memory_space<vmem>>, vector<1x128x49xf32>,
    return
  }
}

</mosaic_0001>

<bundles_post_ra>
// kernel: tpu_custom_call.1
= control target key start
LH: loop header
LB: loop body
LE: loop exit
PB: predicated region body
PF: predicated region fallthrough
CT: control target
= control target key end

     0   :  { %vm30_vm0 = vcmask 400384   ;;  %s1504_s0 = inlined_call_operand.vmem [shape: f32[1,128,49], index: 0, kind: input, shape index: {}]   ;;  %s1505_s1 = inlined_call_operand.vmem [shape: f32[1,128,1], index: 1, kind: input, shape index: {}]   ;;  %s1506_s2 = inlined_call_operand.vmem [shape: f32[1,128,1], index: 2, kind: input, shape index: {}]   ;;  %s1507_s3 = inlined_call_operand.vmem [shape: f32[1,128,49], index: 3, kind: output, shape index: {}]  }
   0x1   :  { %v18_v0 = vld [vmem:[%s1504_s0 + $0x20] sm:$0xff]  ;;  %v16_v1 = vld [vmem:[%s1504_s0 + $0x10] sm:$0xff]  ;;  %v19_v6 = vld [vmem:[%s1504_s0 + $0x28] sm:$0xff] }
   0x2   :  { %v14_v2 = vld [vmem:[%s1504_s0] sm:$0xff]  ;;  %v43_v3 = vsel %vm30_vm0, %v18_v0, 0.0  ;;  %v37_v4 = vsel %vm30_vm0, %v16_v1, 0.0  ;;  %v17_v7 = vld [vmem:[%s1504_s0 + $0x18] sm:$0xff]  ;;  %v15_v8 = vld [vmem:[%s1504_s0 + $0x8] sm:$0xff]  ;;  %v46_v9 = vsel %vm30_vm0, %v19_v6, 0.0  ;;  %v83_v36 = vmul.f32 %v18_v0, %v18_v0 }
   0x3   :  { %v31_v5 = vsel %vm30_vm0, %v14_v2, 0.0  ;;  %44 = vadd.xlane.f32.xlu2 %v43_v3  ;;  %38 = vadd.xlane.f32.xlu1 %v37_v4  ;;  %v40_v10 = vsel %vm30_vm0, %v17_v7, 0.0  ;;  %v34_v11 = vsel %vm30_vm0, %v15_v8, 0.0  ;;  %v22_v12 = vld [vmem:[%s1504_s0 + $0x40] sm:$0xff]  ;;  %v21_v13 = vld [vmem:[%s1504_s0 + $0x38] sm:$0xff]  ;;  %v20_v14 = vld [vmem:[%s1504_s0 + $0x30] sm:$0xff]  ;;  %v80_v30 = vmul.f32 %v15_v8, %v15_v8 }
   0x4   :  { %32 = vadd.xlane.f32.xlu0 %v31_v5  ;;  %v55_v15 = vsel %vm30_vm0, %v22_v12, 0.0  ;;  %v52_v16 = vsel %vm30_vm0, %v21_v13, 0.0  ;;  %v49_v17 = vsel %vm30_vm0, %v20_v14, 0.0  ;;  %v25_v18 = vld [vmem:[%s1504_s0 + $0x58] sm:$0xff]  ;;  %v24_v19 = vld [vmem:[%s1504_s0 + $0x50] sm:$0xff]  ;;  %v23_v20 = vld [vmem:[%s1504_s0 + $0x48] sm:$0xff]  ;;  %v79_v31 = vmul.f32 %v14_v2, %v14_v2 }
   0x5   :  { %v64_v21 = vsel %vm30_vm0, %v25_v18, 0.0  ;;  %v61_v22 = vsel %vm30_vm0, %v24_v19, 0.0  ;;  %v58_v23 = vsel %vm30_vm0, %v23_v20, 0.0  ;;  %v28_v24 = vld [vmem:[%s1504_s0 + $0x70] sm:$0xff]  ;;  %v27_v25 = vld [vmem:[%s1504_s0 + $0x68] sm:$0xff]  ;;  %v26_v26 = vld [vmem:[%s1504_s0 + $0x60] sm:$0xff]  ;;  %v82_v37 = vmul.f32 %v17_v7, %v17_v7 }
   0x6   :  { %v73_v27 = vsel %vm30_vm0, %v28_v24, 0.0  ;;  %v70_v28 = vsel %vm30_vm0, %v27_v25, 0.0  ;;  %v67_v29 = vsel %vm30_vm0, %v26_v26, 0.0  ;;  %v29_v32 = vld [vmem:[%s1504_s0 + $0x78] sm:$0xff]  ;;  %v98_v33 = vsel %vm30_vm0, %v80_v30, 0.0 }
   0x7   :  { %v95_v34 = vsel %vm30_vm0, %v79_v31, 0.0  ;;  %v76_v35 = vsel %vm30_vm0, %v29_v32, 0.0  ;;  %v81_v38 = vmul.f32 %v16_v1, %v16_v1  ;;  %v107_v39 = vsel %vm30_vm0, %v83_v36, 0.0 }
   0x8   :  { %v104_v40 = vsel %vm30_vm0, %v82_v37, 0.0  ;;  %v86_v42 = vmul.f32 %v21_v13, %v21_v13  ;;  %v85_v43 = vmul.f32 %v20_v14, %v20_v14  ;;  %v84_v44 = vmul.f32 %v19_v6, %v19_v6 }
   0x9   :  { %v101_v41 = vsel %vm30_vm0, %v81_v38, 0.0  ;;  %v89_v48 = vmul.f32 %v24_v19, %v24_v19  ;;  %v88_v49 = vmul.f32 %v23_v20, %v23_v20  ;;  %v87_v50 = vmul.f32 %v22_v12, %v22_v12 }
   0xa   :  { %v116_v45 = vsel %vm30_vm0, %v86_v42, 0.0  ;;  %v113_v46 = vsel %vm30_vm0, %v85_v43, 0.0  ;;  %v110_v47 = vsel %vm30_vm0, %v84_v44, 0.0  ;;  %v92_v54 = vmul.f32 %v27_v25, %v27_v25 }
   0xb   :  { %47 = vadd.xlane.f32.xlu2 %v46_v9  ;;  %41 = vadd.xlane.f32.xlu1 %v40_v10  ;;  %v125_v51 = vsel %vm30_vm0, %v89_v48, 0.0  ;;  %v122_v52 = vsel %vm30_vm0, %v88_v49, 0.0  ;;  %v119_v53 = vsel %vm30_vm0, %v87_v50, 0.0  ;;  %v91_v55 = vmul.f32 %v26_v26, %v26_v26 }
   0xc   :  { %35 = vadd.xlane.f32.xlu0 %v34_v11  ;;  %v90_v56 = vmul.f32 %v25_v18, %v25_v18  ;;  %v134_v57 = vsel %vm30_vm0, %v92_v54, 0.0  ;;  %v94_v60 = vmul.f32 %v29_v32, %v29_v32  ;;  %v93_v61 = vmul.f32 %v28_v24, %v28_v24 }
   0xd   :  { %v131_v58 = vsel %vm30_vm0, %v91_v55, 0.0 }
   0xe   :  { %v128_v59 = vsel %vm30_vm0, %v90_v56, 0.0  ;;  %v140_v62 = vsel %vm30_vm0, %v94_v60, 0.0  ;;  %v137_v63 = vsel %vm30_vm0, %v93_v61, 0.0 }
  0x13   :  { %56 = vadd.xlane.f32.xlu2 %v55_v15  ;;  %53 = vadd.xlane.f32.xlu1 %v52_v16  ;;  %v775_v15 = vmov 0  }
  0x14   :  { %50 = vadd.xlane.f32.xlu0 %v49_v17  ;;  %724 = vset.pattern.permute.xlu2 %v775_v15 }
  0x15   :  { %725 = vset.pattern.permute.xlu0 %v775_v15  ;;  %726 = vset.pattern.permute.xlu1 %v775_v15 }
  0x1b   :  { %65 = vadd.xlane.f32.xlu2 %v64_v21  ;;  %62 = vadd.xlane.f32.xlu1 %v61_v22 }
  0x1c   :  { %59 = vadd.xlane.f32.xlu0 %v58_v23 }
  0x23   :  { %74 = vadd.xlane.f32.xlu2 %v73_v27  ;;  %71 = vadd.xlane.f32.xlu1 %v70_v28 }
  0x24   :  { %68 = vadd.xlane.f32.xlu0 %v67_v29 }
  0x2b   :  { %99 = vadd.xlane.f32.xlu2 %v98_v33  ;;  %96 = vadd.xlane.f32.xlu1 %v95_v34 }
  0x2c   :  { %77 = vadd.xlane.f32.xlu0 %v76_v35 }
  0x33   :  { %108 = vadd.xlane.f32.xlu2 %v107_v39  ;;  %105 = vadd.xlane.f32.xlu1 %v104_v40 }
  0x34   :  { %102 = vadd.xlane.f32.xlu0 %v101_v41 }
  0x3b   :  { %117 = vadd.xlane.f32.xlu2 %v116_v45  ;;  %114 = vadd.xlane.f32.xlu1 %v113_v46 }
  0x3c   :  { %111 = vadd.xlane.f32.xlu0 %v110_v47 }
  0x43   :  { %126 = vadd.xlane.f32.xlu2 %v125_v51  ;;  %123 = vadd.xlane.f32.xlu1 %v122_v52 }
  0x44   :  { %120 = vadd.xlane.f32.xlu0 %v119_v53 }
  0x4b   :  { %135 = vadd.xlane.f32.xlu2 %v134_v57  ;;  %132 = vadd.xlane.f32.xlu1 %v131_v58 }
  0x4c   :  { %129 = vadd.xlane.f32.xlu0 %v128_v59 }
  0x53   :  { %141 = vadd.xlane.f32.xlu1 %v140_v62 }
  0x54   :  { %138 = vadd.xlane.f32.xlu0 %v137_v63 }
  0x76   :  { %v45_v0 = vpop.xlane.xlu2 %44  ;;  %v39_v1 = vpop.xlane.xlu1 %38 }
  0x77   :  { %v33_v2 = vpop.xlane.xlu0 %32  ;;  %v894_v27 = vmul.f32 0.020408163, %v45_v0  ;;  %v902_v31 = vmul.f32 0.020408163, %v39_v1 }
  0x78   :  { %v884_v16 = vmul.f32 0.020408163, %v33_v2 }
  0x79   :  { %v211_v34 = vmul.f32 %v894_v27, %v894_v27  ;;  %v209_v39 = vmul.f32 %v902_v31, %v902_v31 }
  0x7a   :  { %v207_v20 = vmul.f32 %v884_v16, %v884_v16 }
  0x7e   :  { %v48_v3 = vpop.xlane.xlu2 %47  ;;  %v42_v4 = vpop.xlane.xlu1 %41 }
  0x7f   :  { %v36_v5 = vpop.xlane.xlu0 %35  ;;  %v896_v28 = vmul.f32 0.020408163, %v42_v4  ;;  %v912_v40 = vmul.f32 0.020408163, %v48_v3 }
  0x80   :  { %v886_v17 = vmul.f32 0.020408163, %v36_v5 }
  0x81   :  { %v210_v35 = vmul.f32 %v896_v28, %v896_v28  ;;  %v212_v51 = vmul.f32 %v912_v40, %v912_v40 }
  0x82   :  { %v208_v21 = vmul.f32 %v886_v17, %v886_v17 }
  0x86   :  { %v57_v6 = vpop.xlane.xlu2 %56  ;;  %v54_v7 = vpop.xlane.xlu1 %53 }
  0x87   :  { %v51_v8 = vpop.xlane.xlu0 %50  ;;  %v914_v42 = vmul.f32 0.020408163, %v54_v7  ;;  %v928_v52 = vmul.f32 0.020408163, %v57_v6 }
  0x88   :  { %v916_v45 = vmul.f32 0.020408163, %v51_v8 }
  0x89   :  { %v214_v55 = vmul.f32 %v914_v42, %v914_v42  ;;  %v951_v3 = vmul.f32 %v928_v52, %v928_v52 }
  0x8a   :  { %v213_v58 = vmul.f32 %v916_v45, %v916_v45 }
  0x8e   :  { %v876_v9 = vpop.xlane.xlu2 %65  ;;  %v63_v10 = vpop.xlane.xlu1 %62 }
  0x8f   :  { %v60_v11 = vpop.xlane.xlu0 %59  ;;  %v936_v56 = vmul.f32 0.020408163, %v63_v10  ;;  %v954_v4 = vmul.f32 0.020408163, %v876_v9 }
  0x90   :  { %v943_v59 = vmul.f32 0.020408163, %v60_v11 }
  0x91   :  { %v958_v7 = vmul.f32 %v936_v56, %v936_v56 }
  0x92   :  { %v216_v9 = vmul.f32 %v943_v59, %v943_v59 }
  0x96   :  { %v878_v12 = vpop.xlane.xlu2 %74  ;;  %v880_v13 = vpop.xlane.xlu1 %71 }
  0x97   :  { %v882_v14 = vpop.xlane.xlu0 %68  ;;  %v961_v15 = vmul.f32 0.020408163, %v878_v12 }
  0x9e   :  { %v100_v18 = vpop.xlane.xlu2 %99  ;;  %v97_v19 = vpop.xlane.xlu1 %96 }
  0x9f   :  { %v192_v22 = vmul.f32 0.020408163, %v100_v18  ;;  %v191_v23 = vmul.f32 0.020408163, %v97_v19  ;;  %v892_v24 = vpop.xlane.xlu0 %77  ;;  %v964_v18 = vmul.f32 0.020408163, %v880_v13 }
  0xa0   :  { %v981_v13 = vmul.f32 0.020408163, %v892_v24 }
  0xa1   :  { %v224_v25 = vsub.f32 %v192_v22, %v208_v21  ;;  %v223_v26 = vsub.f32 %v191_v23, %v207_v20  ;;  %v971_v22 = vmul.f32 0.020408163, %v882_v14 }
  0xa3   :  { %v898_v29 = vadd.f32 0.001, %v224_v25  ;;  %v900_v30 = vadd.f32 0.001, %v223_v26 }
  0xa5   :  { %727 = vrsqrt.f32 %v898_v29  ;;  %vm271_vm1 = vweird.f32 %v898_v29  ;;  %vm261_vm4 = vweird.f32 %v900_v30 }
  0xa6   :  { %729 = vrsqrt.f32 %v900_v30  ;;  %v109_v32 = vpop.xlane.xlu2 %108  ;;  %v106_v33 = vpop.xlane.xlu1 %105 }
  0xa7   :  { %v195_v36 = vmul.f32 0.020408163, %v109_v32  ;;  %v194_v37 = vmul.f32 0.020408163, %v106_v33  ;;  %v103_v38 = vpop.xlane.xlu0 %102 }
  0xa8   :  { %v193_v41 = vmul.f32 0.020408163, %v103_v38 }
  0xa9   :  { %v227_v43 = vsub.f32 %v195_v36, %v211_v34  ;;  %v226_v44 = vsub.f32 %v194_v37, %v210_v35 }
  0xaa   :  { %v225_v46 = vsub.f32 %v193_v41, %v209_v39 }
  0xab   :  { %v918_v47 = vpop.eup %727  ;;  %v920_v48 = vadd.f32 0.001, %v227_v43  ;;  %v922_v49 = vadd.f32 0.001, %v226_v44 }
  0xac   :  { %v924_v50 = vpop.eup %729  ;;  %v266_v53 = vmul.f32 %v918_v47, %v898_v29  ;;  %v932_v54 = vadd.f32 0.001, %v225_v46  ;;  %vm272_vm2 = vweird.f32 %v918_v47  ;;  %v218_v29 = vmul.f32 %v954_v4, %v954_v4 }
  0xad   :  { %v256_v57 = vmul.f32 %v924_v50, %v900_v30  ;;  %731 = vrsqrt.f32 %v920_v48  ;;  %vm262_vm3 = vweird.f32 %v924_v50  ;;  %vm1010_vm5 = vmor %vm271_vm1, %vm272_vm2  ;;  %vm291_vm7 = vweird.f32 %v922_v49 }
  0xae   :  { %v267_v60 = vmul.f32 %v918_v47, %v266_v53  ;;  %733 = vrsqrt.f32 %v922_v49  ;;  %v118_v61 = vpop.xlane.xlu2 %117  ;;  %v115_v62 = vpop.xlane.xlu1 %114  ;;  %v415_v53 = vld [vmem:[%s1505_s1] sm:$0xff]  ;;  %vm263_vm6 = vmor %vm261_vm4, %vm262_vm3  ;;  %vm301_vm9 = vweird.f32 %v920_v48  ;;  %vm281_vm11 = vweird.f32 %v932_v54 }
  0xaf   :  { %v257_v63 = vmul.f32 %v924_v50, %v256_v57  ;;  %735 = vrsqrt.f32 %v932_v54  ;;  %v198_v0 = vmul.f32 0.020408163, %v118_v61  ;;  %v197_v1 = vmul.f32 0.020408163, %v115_v62  ;;  %v112_v2 = vpop.xlane.xlu0 %111  ;;  %v416_v61 = vld [vmem:[%s1505_s1 + $0x8] sm:$0xff] }
  0xb0   :  { %v268_v5 = vmul.f32 0.5, %v267_v60  ;;  %v196_v6 = vmul.f32 0.020408163, %v112_v2  ;;  %v1032_v2 = vmul.f32 %v961_v15, %v961_v15 }
  0xb1   :  { %v258_v8 = vmul.f32 0.5, %v257_v63  ;;  %v230_v10 = vsub.f32 %v198_v0, %v214_v55  ;;  %v229_v11 = vsub.f32 %v197_v1, %v213_v58  ;;  %v418_v55 = vld [vmem:[%s1505_s1 + $0x18] sm:$0xff] }
  0xb2   :  { %v269_v19 = vsub.f32 1.5, %v268_v5  ;;  %v228_v20 = vsub.f32 %v196_v6, %v212_v51 }
  0xb3   :  { %v966_v21 = vpop.eup %731  ;;  %v973_v23 = vadd.f32 0.001, %v230_v10  ;;  %v975_v25 = vadd.f32 0.001, %v229_v11  ;;  %v259_v12 = vsub.f32 1.5, %v258_v8 }
  0xb4   :  { %v977_v26 = vpop.eup %733  ;;  %v983_v32 = vadd.f32 0.001, %v228_v20  ;;  %v270_v34 = vmul.f32 %v918_v47, %v269_v19  ;;  %v296_v35 = vmul.f32 %v966_v21, %v920_v48  ;;  %v219_v19 = vmul.f32 %v971_v22, %v971_v22 }
  0xb5   :  { %v985_v33 = vpop.eup %735  ;;  %v286_v14 = vmul.f32 %v977_v26, %v922_v49  ;;  %737 = vrsqrt.f32 %v973_v23  ;;  %v260_v51 = vmul.f32 %v924_v50, %v259_v12  ;;  %v1052_v20 = vmul.f32 %v981_v13, %v981_v13 }
  0xb6   :  { %v276_v24 = vmul.f32 %v985_v33, %v932_v54  ;;  %739 = vrsqrt.f32 %v975_v25  ;;  %v127_v36 = vpop.xlane.xlu2 %126  ;;  %v124_v37 = vpop.xlane.xlu1 %123  ;;  %v274_v60 = vsel %vm1010_vm5, %v918_v47, %v270_v34  ;;  %v297_v62 = vmul.f32 %v966_v21, %v296_v35 }
  0xb7   :  { %v287_v38 = vmul.f32 %v977_v26, %v286_v14  ;;  %741 = vrsqrt.f32 %v983_v32  ;;  %v201_v39 = vmul.f32 0.020408163, %v127_v36  ;;  %v200_v41 = vmul.f32 0.020408163, %v124_v37  ;;  %v121_v43 = vpop.xlane.xlu0 %120 }
  0xb8   :  { %v277_v44 = vmul.f32 %v985_v33, %v276_v24  ;;  %v199_v46 = vmul.f32 0.020408163, %v121_v43  ;;  %v264_v0 = vsel %vm263_vm6, %v924_v50, %v260_v51  ;;  %v220_v47 = vmul.f32 %v964_v18, %v964_v18 }
  0xb9   :  { %v288_v57 = vmul.f32 0.5, %v287_v38  ;;  %v233_v30 = vsub.f32 %v201_v39, %v958_v7  ;;  %v232_v58 = vsub.f32 %v200_v41, %v216_v9  ;;  %v1038_v6 = vmul.f32 %v415_v53, %v264_v0 }
  0xba   :  { %v231_v63 = vsub.f32 %v199_v46, %v951_v3  ;;  %v278_v10 = vmul.f32 0.5, %v277_v44  ;;  %v1044_v50 = vmul.f32 %v416_v61, %v274_v60  ;;  %v298_v12 = vmul.f32 0.5, %v297_v62 }
  0xbb   :  { %v1028_v1 = vpop.eup %737  ;;  %v1036_v5 = vadd.f32 0.001, %v232_v58  ;;  %v289_v8 = vsub.f32 1.5, %v288_v57  ;;  %v1055_v9 = vadd.f32 0.001, %v233_v30  ;;  %497 = vperm.xlu2 %724, %v1038_v6   ;;  %vm292_vm8 = vweird.f32 %v977_v26 }
  0xbc   :  { %v1040_v7 = vpop.eup %739  ;;  %v1042_v3 = vadd.f32 0.001, %v231_v63  ;;  %v326_v14 = vmul.f32 %v1028_v1, %v973_v23  ;;  %502 = vperm.xlu0 %725, %v1044_v50   ;;  %v279_v41 = vsub.f32 1.5, %v278_v10  ;;  %vm293_vm10 = vmor %vm291_vm7, %vm292_vm8  ;;  %v299_v0 = vsub.f32 1.5, %v298_v12 }
  0xbd   :  { %v1046_v11 = vpop.eup %741  ;;  %743 = vrsqrt.f32 %v1036_v5  ;;  %v316_v36 = vmul.f32 %v1040_v7, %v975_v25  ;;  %v290_v46 = vmul.f32 %v977_v26, %v289_v8  ;;  %vm302_vm12 = vweird.f32 %v966_v21 }
  0xbe   :  { %v306_v34 = vmul.f32 %v1046_v11, %v983_v32  ;;  %v136_v35 = vpop.xlane.xlu2 %135  ;;  %v133_v24 = vpop.xlane.xlu1 %132  ;;  %745 = vrsqrt.f32 %v1042_v3  ;;  %v327_v57 = vmul.f32 %v1028_v1, %v326_v14  ;;  %v280_v14 = vmul.f32 %v985_v33, %v279_v41  ;;  %vm303_vm1 = vmor %vm301_vm9, %vm302_vm12 }
  0xbf   :  { %v204_v37 = vmul.f32 0.020408163, %v136_v35  ;;  %v203_v38 = vmul.f32 0.020408163, %v133_v24  ;;  %v130_v39 = vpop.xlane.xlu0 %129  ;;  %747 = vrsqrt.f32 %v1055_v9  ;;  %v317_v60 = vmul.f32 %v1040_v7, %v316_v36  ;;  %v417_v36 = vld [vmem:[%s1505_s1 + $0x10] sm:$0xff] }
  0xc0   :  { %v307_v43 = vmul.f32 %v1046_v11, %v306_v34  ;;  %v202_v44 = vmul.f32 0.020408163, %v130_v39  ;;  %v294_v62 = vsel %vm293_vm10, %v977_v26, %v290_v46  ;;  %v1097_v26 = vmul.f32 0.5, %v327_v57 }
  0xc1   :  { %v236_v51 = vsub.f32 %v204_v37, %v220_v47  ;;  %v235_v53 = vsub.f32 %v203_v38, %v219_v19  ;;  %v1087_v8 = vmul.f32 %v418_v55, %v294_v62  ;;  %vm311_vm13 = vweird.f32 %v983_v32  ;;  %v420_v32 = vld [vmem:[%s1505_s1 + $0x28] sm:$0xff] }
  0xc2   :  { %v308_v30 = vmul.f32 0.5, %v307_v43  ;;  %v234_v58 = vsub.f32 %v202_v44, %v218_v29  ;;  %v318_v24 = vmul.f32 0.5, %v317_v60  ;;  %vm282_vm14 = vweird.f32 %v985_v33 }
  0xc3   :  { %v1080_v61 = vadd.f32 0.001, %v235_v53  ;;  %v1083_v63 = vpop.eup %743  ;;  %v1094_v19 = vadd.f32 0.001, %v236_v51  ;;  %512 = vperm.xlu2 %724, %v1087_v8   ;;  %vm283_vm15 = vmor %vm281_vm11, %vm282_vm14  ;;  %v300_v44 = vmul.f32 %v966_v21, %v299_v0  ;;  %v419_v53 = vld [vmem:[%s1505_s1 + $0x20] sm:$0xff]  ;;  %vm312_vm2 = vweird.f32 %v1046_v11 }
  0xc4   :  { %v1085_v47 = vadd.f32 0.001, %v234_v58  ;;  %v1090_v29 = vpop.eup %745  ;;  %v309_v49 = vsub.f32 1.5, %v308_v30  ;;  %v346_v10 = vmul.f32 %v1083_v63, %v1036_v5  ;;  %v284_v46 = vsel %vm283_vm15, %v985_v33, %v280_v14  ;;  %vm1145_vm3 = vmor %vm311_vm13, %vm312_vm2 }
  0xc5   :  { %v336_v12 = vmul.f32 %v1090_v29, %v1042_v3  ;;  %749 = vrsqrt.f32 %v1080_v61  ;;  %v1104_v35 = vpop.eup %747  ;;  %v1125_v30 = vmul.f32 %v417_v36, %v284_v46  ;;  %v319_v33 = vsub.f32 1.5, %v318_v24 }
  0xc6   :  { %v142_v34 = vpop.xlane.xlu1 %141  ;;  %751 = vrsqrt.f32 %v1085_v47  ;;  %v347_v39 = vmul.f32 %v1083_v63, %v346_v10  ;;  %v310_v55 = vmul.f32 %v1046_v11, %v309_v49  ;;  %v356_v57 = vmul.f32 %v1104_v35, %v1055_v9 }
  0xc7   :  { %v206_v37 = vmul.f32 0.020408163, %v142_v34  ;;  %v139_v38 = vpop.xlane.xlu0 %138  ;;  %v337_v41 = vmul.f32 %v1090_v29, %v336_v12  ;;  %753 = vrsqrt.f32 %v1094_v19  ;;  %v304_v60 = vsel %vm303_vm1, %v966_v21, %v300_v44  ;;  %507 = vperm.xlu1 %726, %v1125_v30   ;;  %v421_v44 = vld [vmem:[%s1505_s1 + $0x30] sm:$0xff] }
  0xc8   :  { %v205_v43 = vmul.f32 0.020408163, %v139_v38  ;;  %v348_v0 = vmul.f32 0.5, %v347_v39  ;;  %v314_v12 = vsel %vm1145_vm3, %v1046_v11, %v310_v55  ;;  %vm321_vm4 = vweird.f32 %v975_v25 }
  0xc9   :  { %v238_v51 = vsub.f32 %v206_v37, %v1052_v20  ;;  %v338_v54 = vmul.f32 0.5, %v337_v41  ;;  %v357_v34 = vmul.f32 %v1104_v35, %v356_v57  ;;  %v329_v37 = vsub.f32 1.5, %v1097_v26 }
  0xca   :  { %v237_v58 = vsub.f32 %v205_v43, %v1032_v2  ;;  %v1141_v2 = vmul.f32 %v419_v53, %v304_v60  ;;  %v320_v38 = vmul.f32 %v1040_v7, %v319_v33  ;;  %vm322_vm5 = vweird.f32 %v1040_v7 }
  0xcb   :  { %v1132_v20 = vadd.f32 0.001, %v238_v51  ;;  %v1136_v62 = vpop.eup %749  ;;  %v339_v21 = vsub.f32 1.5, %v338_v54  ;;  %v349_v25 = vsub.f32 1.5, %v348_v0  ;;  %v1173_v41 = vmul.f32 %v420_v32, %v314_v12  ;;  %vm1175_vm6 = vmor %vm321_vm4, %vm322_vm5  ;;  %v423_v51 = vld [vmem:[%s1505_s1 + $0x40] sm:$0xff] }
  0xcc   :  { %v1139_v49 = vadd.f32 0.001, %v237_v58  ;;  %v1149_v10 = vpop.eup %751  ;;  %v376_v14 = vmul.f32 %v1136_v62, %v1080_v61  ;;  %517 = vperm.xlu2 %724, %v1141_v2   ;;  %vm341_vm7 = vweird.f32 %v1042_v3  ;;  %v324_v26 = vsel %vm1175_vm6, %v1040_v7, %v320_v38 }
  0xcd   :  { %755 = vrsqrt.f32 %v1132_v20  ;;  %v366_v24 = vmul.f32 %v1149_v10, %v1085_v47  ;;  %v1166_v36 = vpop.eup %753  ;;  %v340_v46 = vmul.f32 %v1090_v29, %v339_v21  ;;  %vm342_vm8 = vweird.f32 %v1090_v29 }
  0xce   :  { %757 = vrsqrt.f32 %v1139_v49  ;;  %v377_v11 = vmul.f32 %v1136_v62, %v376_v14  ;;  %vm331_vm9 = vweird.f32 %v973_v23  ;;  %v358_v53 = vmul.f32 0.5, %v357_v34  ;;  %vm343_vm10 = vmor %vm341_vm7, %vm342_vm8  ;;  %v422_v23 = vld [vmem:[%s1505_s1 + $0x38] sm:$0xff] }
  0xcf   :  { %v367_v39 = vmul.f32 %v1149_v10, %v366_v24  ;;  %v386_v3 = vmul.f32 %v1166_v36, %v1094_v19  ;;  %v330_v54 = vmul.f32 %v1028_v1, %v329_v37  ;;  %vm332_vm11 = vweird.f32 %v1028_v1  ;;  %522 = vperm.xlu1 %726, %v1173_v41   ;;  %v426_v37 = vld [vmem:[%s1505_s1 + $0x58] sm:$0xff] }
  0xd0   :  { %v378_v57 = vmul.f32 0.5, %v377_v11  ;;  %v344_v58 = vsel %vm343_vm10, %v1090_v29, %v340_v46  ;;  %v1200_v0 = vmul.f32 %v421_v44, %v324_v26  ;;  %v350_v21 = vmul.f32 %v1083_v63, %v349_v25  ;;  %vm1217_vm1 = vmor %vm331_vm9, %vm332_vm11  ;;  %v424_v26 = vld [vmem:[%s1505_s1 + $0x48] sm:$0xff] }
  0xd1   :  { %v368_v55 = vmul.f32 0.5, %v367_v39  ;;  %v1202_v48 = vmul.f32 %v423_v51, %v344_v58  ;;  %vm352_vm12 = vweird.f32 %v1083_v63  ;;  %vm372_vm13 = vweird.f32 %v1149_v10  ;;  %v425_v58 = vld [vmem:[%s1505_s1 + $0x50] sm:$0xff] }
  0xd2   :  { %vm351_vm14 = vweird.f32 %v1036_v5  ;;  %vm371_vm15 = vweird.f32 %v1085_v47  ;;  %v359_v34 = vsub.f32 1.5, %v358_v53  ;;  %v387_v24 = vmul.f32 %v1166_v36, %v386_v3 }
  0xd3   :  { %v1194_v7 = vpop.eup %755  ;;  %v369_v60 = vsub.f32 1.5, %v368_v55  ;;  %537 = vperm.xlu0 %725, %v1202_v48   ;;  %v334_v47 = vsel %vm1217_vm1, %v1028_v1, %v330_v54  ;;  %vm373_vm2 = vmor %vm371_vm15, %vm372_vm13  ;;  %v379_v25 = vsub.f32 1.5, %v378_v57  ;;  %vm362_vm4 = vweird.f32 %v1104_v35  ;;  %v458_v55 = vld [vmem:[%s1506_s2 + $0x58] sm:$0xff] }
  0xd4   :  { %v758_v33 = vpop.eup %757  ;;  %v406_v14 = vmul.f32 %v1194_v7, %v1132_v20  ;;  %527 = vperm.xlu2 %724, %v1200_v0   ;;  %vm1235_vm3 = vmor %vm351_vm14, %vm352_vm12  ;;  %v1247_v44 = vmul.f32 %v422_v23, %v334_v47  ;;  %v388_v51 = vmul.f32 0.5, %v387_v24  ;;  %v360_v53 = vmul.f32 %v1104_v35, %v359_v34  ;;  %v428_v24 = vld [vmem:[%s1505_s1 + $0x68] sm:$0xff]  ;;  %v430_v47 = vld [vmem:[%s1505_s1 + $0x78] sm:$0xff] }
  0xd5   :  { %v396_v12 = vmul.f32 %v758_v33, %v1139_v49  ;;  %v370_v32 = vmul.f32 %v1149_v10, %v369_v60  ;;  %v354_v43 = vsel %vm1235_vm3, %v1083_v63, %v350_v21  ;;  %vm402_vm5 = vweird.f32 %v758_v33  ;;  %v429_v21 = vld [vmem:[%s1505_s1 + $0x70] sm:$0xff] }
  0xd6   :  { %v407_v1 = vmul.f32 %v1194_v7, %v406_v14  ;;  %vm361_vm6 = vweird.f32 %v1055_v9  ;;  %vm401_vm7 = vweird.f32 %v1139_v49  ;;  %v1256_v63 = vmul.f32 %v424_v26, %v354_v43  ;;  %v454_v43 = vld [vmem:[%s1506_s2 + $0x38] sm:$0xff] }
  0xd7   :  { %v397_v5 = vmul.f32 %v758_v33, %v396_v12  ;;  %v374_v38 = vsel %vm373_vm2, %v1149_v10, %v370_v32  ;;  %532 = vperm.xlu1 %726, %v1247_v44   ;;  %vm1258_vm8 = vmor %vm361_vm6, %vm362_vm4  ;;  %v380_v57 = vmul.f32 %v1136_v62, %v379_v25  ;;  %vm382_vm9 = vweird.f32 %v1136_v62  ;;  %v451_v25 = vld [vmem:[%s1506_s2 + $0x20] sm:$0xff] }
  0xd8   :  { %v1250_v46 = vmul.f32 %v426_v37, %v374_v38  ;;  %v408_v3 = vmul.f32 0.5, %v407_v1  ;;  %vm403_vm10 = vmor %vm401_vm7, %vm402_vm5  ;;  %v389_v9 = vsub.f32 1.5, %v388_v51  ;;  %vm381_vm11 = vweird.f32 %v1080_v61  ;;  %v427_v61 = vld [vmem:[%s1505_s1 + $0x60] sm:$0xff]  ;;  %v449_v38 = vld [vmem:[%s1506_s2 + $0x10] sm:$0xff] }
  0xd9   :  { %v398_v39 = vmul.f32 0.5, %v397_v5  ;;  %v364_v49 = vsel %vm1258_vm8, %v1104_v35, %v360_v53  ;;  %vm383_vm12 = vmor %vm381_vm11, %vm382_vm9  ;;  %vm392_vm13 = vweird.f32 %v1166_v36  ;;  %vm391_vm14 = vweird.f32 %v1094_v19 }
  0xda   :  { %v409_v14 = vsub.f32 1.5, %v408_v3  ;;  %v384_v12 = vsel %vm383_vm12, %v1136_v62, %v380_v57  ;;  %v441_v29 = vmul.f32 %v425_v58, %v364_v49  ;;  %v390_v35 = vmul.f32 %v1166_v36, %v389_v9  ;;  %vm393_vm1 = vmor %vm391_vm14, %vm392_vm13  ;;  %v460_v57 = vld [vmem:[%s1506_s2 + $0x68] sm:$0xff] }
  0xdb   :  { %v399_v10 = vsub.f32 1.5, %v398_v39  ;;  %552 = vperm.xlu0 %725, %v1250_v46   ;;  %vm412_vm15 = vweird.f32 %v1194_v7  ;;  %vm411_vm2 = vweird.f32 %v1132_v20  ;;  %v464_v19 = vmul.f32 %v1044_v50, %v886_v17  ;;  %v448_v20 = vld [vmem:[%s1506_s2 + $0x8] sm:$0xff]  ;;  %v447_v17 = vld [vmem:[%s1506_s2] sm:$0xff] }
  0xdc   :  { %542 = vperm.xlu2 %724, %v1256_v63   ;;  %v410_v34 = vmul.f32 %v1194_v7, %v409_v14  ;;  %v394_v62 = vsel %vm393_vm1, %v1166_v36, %v390_v35  ;;  %vm413_vm3 = vmor %vm411_vm2, %vm412_vm15  ;;  %v463_v11 = vmul.f32 %v1038_v6, %v884_v16  ;;  %v465_v50 = vmul.f32 %v1125_v30, %v902_v31 }
  0xdd   :  { %v400_v54 = vmul.f32 %v758_v33, %v399_v10  ;;  %v444_v23 = vmul.f32 %v428_v24, %v394_v62  ;;  %v480_v37 = vsub.f32 %v448_v20, %v464_v19  ;;  %v466_v39 = vmul.f32 %v1087_v8, %v896_v28  ;;  %v457_v10 = vld [vmem:[%s1506_s2 + $0x50] sm:$0xff] }
  0xde   :  { %v414_v5 = vsel %vm413_vm3, %v1194_v7, %v410_v34  ;;  %v467_v7 = vmul.f32 %v1141_v2, %v894_v27  ;;  %v479_v16 = vsub.f32 %v447_v17, %v463_v11  ;;  %v481_v6 = vsub.f32 %v449_v38, %v465_v50  ;;  %v450_v27 = vld [vmem:[%s1506_s2 + $0x18] sm:$0xff]  ;;  %v452_v2 = vld [vmem:[%s1506_s2 + $0x28] sm:$0xff]  ;;  %v759_v19 = vld [vmem:[%s1504_s0 + $0x10] sm:$0xff] }
  0xdf   :  { %v404_v60 = vsel %vm403_vm10, %v758_v33, %v400_v54  ;;  %547 = vperm.xlu1 %726, %v441_v29   ;;  %v1284_v33 = vmul.f32 %v427_v61, %v384_v12  ;;  %v446_v36 = vmul.f32 %v430_v47, %v414_v5  ;;  %v468_v31 = vmul.f32 %v1173_v41, %v912_v40  ;;  %v453_v40 = vld [vmem:[%s1506_s2 + $0x30] sm:$0xff]  ;;  %v760_v11 = vld [vmem:[%s1504_s0 + $0x28] sm:$0xff] }
  0xe0   :  { %v1280_v32 = vmul.f32 %v429_v21, %v404_v60  ;;  %v483_v1 = vsub.f32 %v451_v25, %v467_v7  ;;  %v470_v30 = vmul.f32 %v1247_v44, %v914_v42  ;;  %v482_v28 = vsub.f32 %v450_v27, %v466_v39  ;;  %v455_v44 = vld [vmem:[%s1506_s2 + $0x40] sm:$0xff] }
  0xe1   :  { %v484_v8 = vsub.f32 %v452_v2, %v468_v31  ;;  %v469_v51 = vmul.f32 %v1200_v0, %v916_v45  ;;  %v471_v42 = vmul.f32 %v1202_v48, %v928_v52  ;;  %v473_v41 = vmul.f32 %v441_v29, %v936_v56  ;;  %v456_v52 = vld [vmem:[%s1506_s2 + $0x48] sm:$0xff]  ;;  %v762_v39 = vld [vmem:[%s1504_s0 + $0x40] sm:$0xff] }
  0xe2   :  { %v486_v26 = vsub.f32 %v454_v43, %v470_v30  ;;  %v472_v3 = vmul.f32 %v1256_v63, %v943_v59  ;;  %v474_v56 = vmul.f32 %v1250_v46, %v954_v4  ;;  %v476_v48 = vmul.f32 %v444_v23, %v964_v18  ;;  %v459_v4 = vld [vmem:[%s1506_s2 + $0x60] sm:$0xff]  ;;  %v461_v46 = vld [vmem:[%s1506_s2 + $0x70] sm:$0xff] }
  0xe3   :  { %567 = vperm.xlu0 %725, %v1280_v32   ;;  %v485_v45 = vsub.f32 %v453_v40, %v469_v51  ;;  %v487_v0 = vsub.f32 %v455_v44, %v471_v42  ;;  %v489_v53 = vsub.f32 %v457_v10, %v473_v41  ;;  %v475_v9 = vmul.f32 %v1284_v33, %v971_v22  ;;  %v462_v22 = vld [vmem:[%s1506_s2 + $0x78] sm:$0xff]  ;;  %v764_v42 = vld [vmem:[%s1504_s0 + $0x20] sm:$0xff] }
  0xe4   :  { %557 = vperm.xlu2 %724, %v1284_v33   ;;  %v488_v59 = vsub.f32 %v456_v52, %v472_v3  ;;  %v490_v63 = vsub.f32 %v458_v55, %v474_v56  ;;  %v492_v54 = vsub.f32 %v460_v57, %v476_v48  ;;  %v477_v18 = vmul.f32 %v1280_v32, %v961_v15  ;;  %v765_v44 = vld [vmem:[%s1504_s0 + $0x58] sm:$0xff] }
  0xe5   :  { %v491_v49 = vsub.f32 %v459_v4, %v475_v9  ;;  %v478_v60 = vmul.f32 %v446_v36, %v981_v13  ;;  %v766_v57 = vld [vmem:[%s1504_s0 + $0x18] sm:$0xff]  ;;  %v768_v4 = vld [vmem:[%s1504_s0 + $0x70] sm:$0xff] }
  0xe6   :  { %v493_v58 = vsub.f32 %v461_v46, %v477_v18 }
  0xe7   :  { %562 = vperm.xlu1 %726, %v444_v23   ;;  %v494_v14 = vsub.f32 %v462_v22, %v478_v60 }
  0xeb   :  { %598 = vperm.xlu0 %725, %v480_v37  }
  0xec   :  { %572 = vperm.xlu2 %724, %v446_v36  }
  0xef   :  { %593 = vperm.xlu1 %726, %v479_v16  }
  0xf3   :  { %613 = vperm.xlu0 %725, %v483_v1  }
  0xf4   :  { %603 = vperm.xlu2 %724, %v481_v6   ;;  %v761_v6 = vld [vmem:[%s1504_s0 + $0x8] sm:$0xff] }
  0xf7   :  { %608 = vperm.xlu1 %726, %v482_v28  }
  0xfb   :  { %628 = vperm.xlu0 %725, %v486_v26   ;;  %v763_v26 = vld [vmem:[%s1504_s0] sm:$0xff] }
  0xfc   :  { %618 = vperm.xlu2 %724, %v484_v8  }
  0xff   :  { %623 = vperm.xlu1 %726, %v485_v45  }
 0x103   :  { %643 = vperm.xlu0 %725, %v489_v53  }
 0x104   :  { %633 = vperm.xlu2 %724, %v487_v0  }
 0x107   :  { %638 = vperm.xlu1 %726, %v488_v59  }
 0x10b   :  { %658 = vperm.xlu0 %725, %v492_v54   ;;  %v767_v54 = vld [vmem:[%s1504_s0 + $0x38] sm:$0xff] }
 0x10c   :  { %648 = vperm.xlu2 %724, %v490_v63  }
 0x10f   :  { %653 = vperm.xlu1 %726, %v491_v49  }
 0x114   :  { %663 = vperm.xlu2 %724, %v493_v58  }
 0x115   :  { %v498_v21 = vpop.permute.xlu2 %497 }
 0x116   :  { %v575_v51 = vmul.f32 %v763_v26, %v498_v21 }
 0x117   :  { %668 = vperm.xlu1 %726, %v494_v14  }
 0x11d   :  { %v513_v12 = vpop.permute.xlu2 %512 }
 0x11e   :  { %v578_v59 = vmul.f32 %v766_v57, %v513_v12 }
 0x126   :  { %v518_v61 = vpop.permute.xlu2 %517 }
 0x127   :  { %v579_v41 = vmul.f32 %v764_v42, %v518_v61  ;;  %v769_v61 = vld [vmem:[%s1504_s0 + $0x30] sm:$0xff] }
 0x12e   :  { %v1377_v15 = vpop.permute.xlu2 %527  ;;  %v503_v35 = vpop.permute.xlu0 %502 }
 0x12f   :  { %v576_v1 = vmul.f32 %v761_v6, %v503_v35 }
 0x136   :  { %v1379_v29 = vpop.permute.xlu2 %542 }
 0x139   :  { %v508_v32 = vpop.permute.xlu1 %507 }
 0x13a   :  { %v577_v5 = vmul.f32 %v759_v19, %v508_v32  ;;  %v581_v32 = vmul.f32 %v769_v61, %v1377_v15 }
 0x13e   :  { %v1381_v33 = vpop.permute.xlu2 %557 }
 0x141   :  { %v523_v34 = vpop.permute.xlu1 %522 }
 0x142   :  { %v580_v17 = vmul.f32 %v760_v11, %v523_v34  ;;  %v770_v34 = vld [vmem:[%s1504_s0 + $0x50] sm:$0xff] }
 0x145   :  { %v538_v62 = vpop.permute.xlu0 %537 }
 0x146   :  { %v1383_v13 = vpop.permute.xlu2 %572  ;;  %v583_v27 = vmul.f32 %v762_v39, %v538_v62 }
 0x149   :  { %v533_v24 = vpop.permute.xlu1 %532 }
 0x14a   :  { %v582_v9 = vmul.f32 %v767_v54, %v533_v24 }
 0x14d   :  { %v553_v20 = vpop.permute.xlu0 %552 }
 0x14e   :  { %v604_v47 = vpop.permute.xlu2 %603  ;;  %v586_v10 = vmul.f32 %v765_v44, %v553_v20  ;;  %v771_v20 = vld [vmem:[%s1504_s0 + $0x48] sm:$0xff] }
 0x14f   :  { %v673_v23 = vadd.f32 %v604_v47, %v577_v5 }
 0x151   :  { %v689_v36 = vmax.f32 %v673_v23, 0.0  ;;  %v548_v37 = vpop.permute.xlu1 %547  ;;  %v584_v23 = vmul.f32 %v771_v20, %v1379_v29 }
 0x152   :  { %v585_v62 = vmul.f32 %v770_v34, %v548_v37  ;;  %v772_v37 = vld [vmem:[%s1504_s0 + $0x68] sm:$0xff] }
 0x153   :  { %705 = vst.msk [vmem:[%s1507_s3 + $0x10] sm:$0xff] %vm30_vm0, %v689_v36 }
 0x155   :  { %v568_v7 = vpop.permute.xlu0 %567 }
 0x156   :  { %v619_v50 = vpop.permute.xlu2 %618  ;;  %v589_v18 = vmul.f32 %v768_v4, %v568_v7 }
 0x157   :  { %v676_v38 = vadd.f32 %v619_v50, %v580_v17 }
 0x159   :  { %v692_v25 = vmax.f32 %v676_v38, 0.0  ;;  %v1399_v16 = vpop.permute.xlu1 %562 }
 0x15a   :  { %v588_v11 = vmul.f32 %v772_v37, %v1399_v16 }
 0x15b   :  { %708 = vst.msk [vmem:[%s1507_s3 + $0x28] sm:$0xff] %vm30_vm0, %v692_v25  ;;  %v773_v25 = vld [vmem:[%s1504_s0 + $0x60] sm:$0xff] }
 0x15c   :  { %v587_v6 = vmul.f32 %v773_v25, %v1381_v33 }
 0x15d   :  { %v599_v30 = vpop.permute.xlu0 %598 }
 0x15e   :  { %v634_v31 = vpop.permute.xlu2 %633  ;;  %v672_v43 = vadd.f32 %v599_v30, %v576_v1 }
 0x15f   :  { %v679_v2 = vadd.f32 %v634_v31, %v583_v27  ;;  %v774_v27 = vld [vmem:[%s1504_s0 + $0x78] sm:$0xff] }
 0x160   :  { %v688_v8 = vmax.f32 %v672_v43, 0.0  ;;  %v590_v31 = vmul.f32 %v774_v27, %v1383_v13 }
 0x161   :  { %v695_v28 = vmax.f32 %v679_v2, 0.0  ;;  %v594_v40 = vpop.permute.xlu1 %593 }
 0x162   :  { %704 = vst.msk [vmem:[%s1507_s3 + $0x8] sm:$0xff] %vm30_vm0, %v688_v8  ;;  %v671_v45 = vadd.f32 %v594_v40, %v575_v51 }
 0x163   :  { %711 = vst.msk [vmem:[%s1507_s3 + $0x40] sm:$0xff] %vm30_vm0, %v695_v28 }
 0x164   :  { %v687_v3 = vmax.f32 %v671_v45, 0.0 }
 0x165   :  { %v614_v53 = vpop.permute.xlu0 %613 }
 0x166   :  { %v649_v0 = vpop.permute.xlu2 %648  ;;  %v675_v56 = vadd.f32 %v614_v53, %v579_v41  ;;  %703 = vst.msk [vmem:[%s1507_s3] sm:$0xff] %vm30_vm0, %v687_v3 }
 0x167   :  { %v682_v52 = vadd.f32 %v649_v0, %v586_v10 }
 0x168   :  { %v691_v55 = vmax.f32 %v675_v56, 0.0 }
 0x169   :  { %v698_v48 = vmax.f32 %v682_v52, 0.0  ;;  %v609_v63 = vpop.permute.xlu1 %608 }
 0x16a   :  { %707 = vst.msk [vmem:[%s1507_s3 + $0x20] sm:$0xff] %vm30_vm0, %v691_v55  ;;  %v674_v46 = vadd.f32 %v609_v63, %v578_v59 }
 0x16b   :  { %714 = vst.msk [vmem:[%s1507_s3 + $0x58] sm:$0xff] %vm30_vm0, %v698_v48 }
 0x16c   :  { %v690_v60 = vmax.f32 %v674_v46, 0.0 }
 0x16d   :  { %v629_v58 = vpop.permute.xlu0 %628 }
 0x16e   :  { %v664_v49 = vpop.permute.xlu2 %663  ;;  %v678_v21 = vadd.f32 %v629_v58, %v582_v9  ;;  %706 = vst.msk [vmem:[%s1507_s3 + $0x18] sm:$0xff] %vm30_vm0, %v690_v60 }
 0x16f   :  { %v685_v22 = vadd.f32 %v664_v49, %v589_v18 }
 0x170   :  { %v694_v12 = vmax.f32 %v678_v21, 0.0 }
 0x171   :  { %v701_v14 = vmax.f32 %v685_v22, 0.0  ;;  %v624_v35 = vpop.permute.xlu1 %623 }
 0x172   :  { %710 = vst.msk [vmem:[%s1507_s3 + $0x38] sm:$0xff] %vm30_vm0, %v694_v12  ;;  %v677_v24 = vadd.f32 %v624_v35, %v581_v32 }
 0x173   :  { %717 = vst.msk [vmem:[%s1507_s3 + $0x70] sm:$0xff] %vm30_vm0, %v701_v14 }
 0x174   :  { %v693_v5 = vmax.f32 %v677_v24, 0.0 }
 0x175   :  { %v644_v19 = vpop.permute.xlu0 %643 }
 0x176   :  { %v681_v15 = vadd.f32 %v644_v19, %v585_v62  ;;  %709 = vst.msk [vmem:[%s1507_s3 + $0x30] sm:$0xff] %vm30_vm0, %v693_v5 }
 0x178   :  { %v697_v47 = vmax.f32 %v681_v15, 0.0 }
 0x179   :  { %v639_v36 = vpop.permute.xlu1 %638 }
 0x17a   :  { %713 = vst.msk [vmem:[%s1507_s3 + $0x50] sm:$0xff] %vm30_vm0, %v697_v47  ;;  %v680_v17 = vadd.f32 %v639_v36, %v584_v23 }
 0x17c   :  { %v696_v7 = vmax.f32 %v680_v17, 0.0 }
 0x17d   :  { %v659_v50 = vpop.permute.xlu0 %658 }
 0x17e   :  { %v684_v38 = vadd.f32 %v659_v50, %v588_v11  ;;  %712 = vst.msk [vmem:[%s1507_s3 + $0x48] sm:$0xff] %vm30_vm0, %v696_v7 }
 0x180   :  { %v700_v29 = vmax.f32 %v684_v38, 0.0 }
 0x181   :  { %v654_v16 = vpop.permute.xlu1 %653 }
 0x182   :  { %716 = vst.msk [vmem:[%s1507_s3 + $0x68] sm:$0xff] %vm30_vm0, %v700_v29  ;;  %v683_v1 = vadd.f32 %v654_v16, %v587_v6 }
 0x184   :  { %v699_v39 = vmax.f32 %v683_v1, 0.0 }
 0x186   :  { %715 = vst.msk [vmem:[%s1507_s3 + $0x60] sm:$0xff] %vm30_vm0, %v699_v39 }
 0x189   :  { %v669_v33 = vpop.permute.xlu1 %668 }
 0x18a   :  { %v686_v30 = vadd.f32 %v669_v33, %v590_v31 }
 0x18c   :  { %v702_v2 = vmax.f32 %v686_v30, 0.0 }
 0x18e   :  { %718 = vst.msk [vmem:[%s1507_s3 + $0x78] sm:$0xff] %vm30_vm0, %v702_v2 }

</bundles_post_ra>
